<compile_context>
chip_gen: v7x
topology: tpu7x:2x2x1
jax: 0.10.0
libtpu: 0.0.40
codegen_flags: <defaults>
</compile_context>

<pallas_src>
import jax
import jax.numpy as jnp
from jax.experimental import pallas as pl
from jax.experimental.pallas import tpu as pltpu


def _round_up(x, m):
    return (x + m - 1) // m * m


def _largest_divisor_leq(n, cap):
    """Largest divisor of n that is <= cap (n >= 1, cap >= 1)."""
    cap = max(1, min(cap, n))
    for d in range(cap, 0, -1):
        if n % d == 0:
            return d
    return 1


def _vmem_budget_bytes():
    """Chip-aware VMEM budget: ~48 MiB on 64 MiB parts (v7x), ~100 MiB on 128 MiB parts."""
    cap = 128 << 20
    try:
        info = pltpu.get_tpu_info()
        cap = int(getattr(info, "vmem_capacity_bytes", cap))
    except Exception:
        pass
    return max(16 << 20, min(cap - (16 << 20), int(cap * 0.8)))


def _select_tiles(M, K, N_pad, out_itemsize, vmem_budget, tn_max):
    """Pick (tm, M_pad, tn) so double-buffered x/w/bias/out tiles fit in vmem_budget."""
    half = vmem_budget // 2                      # per pipeline copy (double-buffered)
    M16 = _round_up(max(M, 1), 16)               # bf16 sublane packing

    # Max tm assuming the minimal lane-dense tn = 128.
    min_tn = 128
    tm_cap = (half - 2 * K * min_tn - 32 * min_tn) // (2 * K + min_tn * out_itemsize)
    tm_cap = max(16, (tm_cap // 16) * 16)

    if M16 <= tm_cap:
        # Preferred: one M tile -> the weight streams from HBM exactly once.
        tm, M_pad = M16, M16
    else:
        # Rare path: tile M; prefer a divisor of M16 to avoid over-padding.
        tm = 16 * _largest_divisor_leq(M16 // 16, tm_cap // 16)
        if tm < min(tm_cap, 256):
            tm = tm_cap
        M_pad = tm * pl.cdiv(M16, tm)

    # Max tn for this tm within the VMEM budget, then snap to a divisor of N_pad.
    tn_cap = (half - 2 * K * tm) // (2 * K + 32 + tm * out_itemsize)
    tn_cap = max(128, (min(tn_max, tn_cap) // 128) * 128)
    c = N_pad // 128
    # Keep >= 2 N blocks when M is a single tile so v7x's two TCs can split the stream.
    want_blocks = 2 if (M_pad == tm and c >= 2) else 1
    d_max = max(1, min(tn_cap // 128, c // want_blocks))
    tn = 128 * _largest_divisor_leq(c, d_max)
    return tm, M_pad, tn


def _prefix_mlp_kernel(x_ref, w_ref, b_ref, o_ref):
    # x_ref: (tm, K) bf16   w_ref: (K, tn) bf16   b_ref: (1, tn) f32   o_ref: (tm, tn)
    acc = jnp.dot(x_ref[...], w_ref[...], preferred_element_type=jnp.float32)
    o_ref[...] = (acc + b_ref[...]).astype(o_ref.dtype)


def prefix_mlp_pallas(x2d, w_padded_bf16, b_padded, n_out, *,
                      out_dtype=jnp.float32, tn_max=16384):
    """y = x2d @ W + b, tiled over (M, N); K (zdim) is small and left un-tiled.

    x2d:          (M, K)      float32 activations
    w_padded_bf16:(K, N_pad)  bfloat16 weight, pre-padded to a multiple of 128 columns
    b_padded:     (1, N_pad)  float32 bias, pre-padded to match
    n_out:        true N before padding
    returns       (M, n_out)  out_dtype
    """
    M, K = x2d.shape
    Kw, N_pad = w_padded_bf16.shape
    assert K == Kw and b_padded.shape == (1, N_pad) and N_pad % 128 == 0

    out_itemsize = jnp.dtype(out_dtype).itemsize
    vmem_budget = _vmem_budget_bytes()
    tm, M_pad, tn = _select_tiles(M, K, N_pad, out_itemsize, vmem_budget, tn_max)

    # Per-call padding only touches the tiny activation matrix.
    x_p = x2d.astype(jnp.bfloat16)
    if M_pad != M:
        x_p = jnp.pad(x_p, ((0, M_pad - M), (0, 0)))

    grid_m = M_pad // tm
    grid_n = N_pad // tn
    grid = (grid_m, grid_n)

    # Scoped VMEM limit: never above the chip-aware budget, never below the default.
    tile_bytes = tm * K * 2 + K * tn * 2 + 32 * tn + tm * tn * out_itemsize
    vmem_limit = int(min(vmem_budget, max(32 << 20, 2 * tile_bytes + (2 << 20))))

    cost = pl.CostEstimate(
        flops=2 * M_pad * N_pad * K,
        transcendentals=0,
        bytes_accessed=(grid_n * M_pad * K * 2            # x re-read per N block (tiny)
                        + grid_m * (K * N_pad * 2 + N_pad * 4)   # weight + bias stream
                        + M_pad * N_pad * out_itemsize),         # output store
    )

    out = pl.pallas_call(
        _prefix_mlp_kernel,
        out_shape=jax.ShapeDtypeStruct((M_pad, N_pad), out_dtype),
        grid_spec=pltpu.PrefetchScalarGridSpec(
            num_scalar_prefetch=0,
            grid=grid,
            in_specs=[
                pl.BlockSpec((tm, K), lambda i, j: (i, 0)),   # activations (tiny, resident)
                pl.BlockSpec((K, tn), lambda i, j: (0, j)),   # weight stream (dominant)
                pl.BlockSpec((1, tn), lambda i, j: (0, j)),   # bias follows the N tile
            ],
            out_specs=pl.BlockSpec((tm, tn), lambda i, j: (i, j)),
        ),
        compiler_params=pltpu.CompilerParams(
            # No reduction axis -> both axes independent; lets v7x shard across its 2 TCs.
            dimension_semantics=("parallel", "parallel"),
            vmem_limit_bytes=vmem_limit,
        ),
        cost_estimate=cost,
    )(x_p, w_padded_bf16, b_padded)

    return out[:M, :n_out]


class PrefixEncoderPallas:
    """JAX/Pallas port of PrefixEncoder.forward."""

    def __init__(self, zdim, hidden_size, n_head, ztokens, n_layer, key,
                 out_dtype=jnp.float32):
        assert hidden_size % n_head == 0
        self.input_dim = zdim
        self.hidden_dim = hidden_size
        self.prefix_seq_len = ztokens
        self.match_n_layer = n_layer
        self.match_n_head = n_head
        self.match_n_embd = hidden_size // n_head
        self.out_dtype = out_dtype

        out_dim = n_layer * 2 * hidden_size
        self.out_dim = out_dim
        kw, kb = jax.random.split(key)
        # Deterministic synthetic init (nn.Linear-like uniform bound).
        bound = 1.0 / (zdim ** 0.5)
        self.weight = jax.random.uniform(
            kw, (zdim, out_dim), jnp.float32, minval=-bound, maxval=bound)
        self.bias = jax.random.uniform(
            kb, (out_dim,), jnp.float32, minval=-bound, maxval=bound)

        # One-time, lane-dense padding of weight / bias (hoisted out of the call path).
        n_pad = _round_up(out_dim, 128)
        w_bf16 = self.weight.astype(jnp.bfloat16)
        b_row = self.bias.reshape(1, out_dim)
        if n_pad != out_dim:
            w_bf16 = jnp.pad(w_bf16, ((0, 0), (0, n_pad - out_dim)))
            b_row = jnp.pad(b_row, ((0, 0), (0, n_pad - out_dim)))
        self.weight_bf16_padded = w_bf16      # (zdim, N_pad) bf16
        self.bias_padded = b_row              # (1, N_pad)   f32
        # TODO(synk): int8 weights + per-channel scales on v5e/v6e (native MXU int path),
        #             fp8 e4m3 on v7x, to halve the dominant HBM weight stream again.

    def __call__(self, input_embd):
        # input_embd: (batch, prefix_seq_len, zdim)
        batch_size, seq_len, zdim = input_embd.shape
        assert seq_len == self.prefix_seq_len
        assert zdim == self.input_dim

        # Hot path: dense layer in the Pallas kernel (tiled, bf16 inputs, f32 acc).
        x2d = input_embd.reshape(batch_size * seq_len, zdim)
        pkv = prefix_mlp_pallas(x2d, self.weight_bf16_padded, self.bias_padded,
                                self.out_dim, out_dtype=self.out_dtype)

        # Glue: views / permute / split. Kept in plain JAX.
        # TODO(synk): fusing permute([2,0,3,1,4]) into out_specs is only lane-dense when
        # head_dim == 128; for smaller head_dim it forces masked partial stores, so the
        # cheaper fix is for the attention consumer to index the un-permuted layout.
        pkv = pkv.reshape(batch_size, self.prefix_seq_len,
                          self.match_n_layer * 2,
                          self.match_n_head, self.match_n_embd)
        # permute([2, 0, 3, 1, 4]) -> (n_layer*2, batch, n_head, seq, head_dim)
        pkv = jnp.transpose(pkv, (2, 0, 3, 1, 4))

        all_kvs = ()
        for layer in range(self.match_n_layer):
            k = pkv[2 * layer]
            v = pkv[2 * layer + 1]
            all_kvs += ((k, v),)
        return all_kvs


if __name__ == "__main__":
    # Small, forward-consistent shapes.
    batch = 2
    ztokens = 8          # prefix_seq_len
    zdim = 32            # model_args.zdim
    hidden_size = 32     # config.n_embd
    n_head = 4
    n_layer = 2          # shallow_decoder_n_layer

    key = jax.random.PRNGKey(0)
    k_param, k_input = jax.random.split(key)

    enc = PrefixEncoderPallas(zdim, hidden_size, n_head, ztokens, n_layer, k_param)
    input_embd = jax.random.normal(k_input, (batch, ztokens, zdim), jnp.float32)

    all_kvs = enc(input_embd)
    jax.block_until_ready(all_kvs)

    # Sanity check against a pure-JAX reference using the same bf16-input / f32-acc math.
    x_ref = input_embd.reshape(batch * ztokens, zdim).astype(jnp.bfloat16).astype(jnp.float32)
    w_ref = enc.weight.astype(jnp.bfloat16).astype(jnp.float32)
    ref = x_ref @ w_ref + enc.bias
    ref = ref.reshape(batch, ztokens, n_layer * 2, n_head, hidden_size // n_head)
    ref = jnp.transpose(ref, (2, 0, 3, 1, 4))
    ok = True
    for i, (k, v) in enumerate(all_kvs):
        ok &= bool(jnp.allclose(k, ref[2 * i], atol=1e-2, rtol=1e-2))
        ok &= bool(jnp.allclose(v, ref[2 * i + 1], atol=1e-2, rtol=1e-2))
        assert k.shape == (batch, n_head, ztokens, hidden_size // n_head)
        assert v.shape == (batch, n_head, ztokens, hidden_size // n_head)
    assert ok

    print("KERNEL_OK")
</pallas_src>

<mosaic_0001>
module attributes {stable_mosaic.version = 11 : i64} {
  func.func @_prefix_mlp_kernel(%arg0: i32, %arg1: i32, %arg2: memref<16x32xbf16, #tpu.memory_space<vmem>>, %arg3: memref<32x128xbf16, #tpu.memory_space<vmem>>, %arg4: memref<1x128xf32, #tpu.memory_space<vmem>>, %arg5: memref<16x128xf32, #tpu.memory_space<vmem>>) attributes {dimension_semantics = [#tpu.dimension_semantics<parallel>, #tpu.dimension_semantics<parallel>], iteration_bounds = array<i64: 1, 1>, scalar_prefetch = 0 : i64, scratch_operands = 0 : i64, tpu.core_type = #tpu.core_type<tc>, window_params = [{transform_indices = @transform_0, window_bounds = array<i64: 16, 32>}, {transform_indices = @transform_1, window_bounds = array<i64: 32, 128>}, {transform_indices = @transform_2, window_bounds = array<i64: 1, 128>}, {transform_indices = @transform_3, window_bounds = array<i64: 16, 128>}]} {
    %c0 = arith.constant 0 : index
    %c0_0 = arith.constant 0 : index
    %0 = vector.load %arg2[%c0, %c0_0] : memref<16x32xbf16, #tpu.memory_space<vmem>>, vector<16x32xbf16>
    %c0_1 = arith.constant 0 : index
    %c0_2 = arith.constant 0 : index
    %1 = vector.load %arg3[%c0_1, %c0_2] : memref<32x128xbf16, #tpu.memory_space<vmem>>, vector<32x128xbf16>
    %cst = arith.constant dense<0.000000e+00> : vector<16x128xf32>
    %2 = tpu.matmul %0, %1, %cst {dimension_numbers = #tpu.dot_dimension_numbers<[1], [0], [0], [1], [0, 0, 1, 1], [], []>} : vector<16x32xbf16>, vector<32x128xbf16>, vector<16x128xf32> -> vector<16x128xf32>
    %c0_3 = arith.constant 0 : index
    %c0_4 = arith.constant 0 : index
    %3 = vector.load %arg4[%c0_3, %c0_4] : memref<1x128xf32, #tpu.memory_space<vmem>>, vector<1x128xf32>
    %4 = vector.broadcast %3 : vector<1x128xf32> to vector<16x128xf32>
    %5 = arith.addf %2, %4 : vector<16x128xf32>
    %c0_5 = arith.constant 0 : index
    %c0_6 = arith.constant 0 : index
    %6 = vector.load %arg5[%c0_5, %c0_6] : memref<16x128xf32, #tpu.memory_space<vmem>>, vector<16x128xf32>
    tpu.vector_store %arg5[%c0_5, %c0_6], %5 {strides = array<i32>} : memref<16x128xf32, #tpu.memory_space<vmem>>, vector<16x128xf32>,
    return
  }
  func.func @transform_0(%arg0: i32, %arg1: i32) -> (i32, i32) {
    %c0_i32 = arith.constant 0 : i32
    %c0_i32_0 = arith.constant 0 : i32
    return %arg0, %c0_i32 : i32, i32
  }
  func.func @transform_1(%arg0: i32, %arg1: i32) -> (i32, i32) {
    %c0_i32 = arith.constant 0 : i32
    %c0_i32_0 = arith.constant 0 : i32
    return %c0_i32, %arg1 : i32, i32
  }
  func.func @transform_2(%arg0: i32, %arg1: i32) -> (i32, i32) {
    %c0_i32 = arith.constant 0 : i32
    %c0_i32_0 = arith.constant 0 : i32
    return %c0_i32, %arg1 : i32, i32
  }
  func.func @transform_3(%arg0: i32, %arg1: i32) -> (i32, i32) {
    %c0_i32 = arith.constant 0 : i32
    return %arg0, %arg1 : i32, i32
  }
}

</mosaic_0001>

<bundles_post_ra>
// kernel: tpu_custom_call.1
= control target key start
LH: loop header
LB: loop body
LE: loop exit
PB: predicated region body
PF: predicated region fallthrough
CT: control target
= control target key end

     0   :  { %8 = vsyncpa [#allocation3], 0  ;;  %s307_s0 = inlined_call_operand.hbm [shape: bf16[16,32], index: 0, kind: input, shape index: {}]   ;;  %s308_s1 = inlined_call_operand.hbm [shape: bf16[32,128], index: 1, kind: input, shape index: {}]   ;;  %s309_s2 = inlined_call_operand.vmem [shape: f32[1,128], index: 2, kind: input, shape index: {}]   ;;  %s310_s3 = inlined_call_operand.hbm [shape: f32[16,128], index: 3, kind: output, shape index: {}]  }
   0x1   :  { %9 = vsyncpa [#allocation6], 0 }
   0x2   :  { %10 = vsyncpa [#allocation4], 0  ;;  %s239_s12 = smov [#allocation2]   ;;  %s167_s16 = scalar_lea.hbm %s307_s0, 128 }
   0x3   :  { %s16_s13 = sshll.u32 %s239_s12, 4  ;;  %p168_p0 = scmp.ne.s32.totalorder %s307_s0, %s167_s16  ;;  %s17_s13 = int_to_ptr.vmem [resolvable:$true] %s16_s13 }
   0x4   :  { %p171_p1 = scmp.lt.u32.totalorder %s167_s16, %s307_s0 }
   0x6   :  { %p173_p2 = pnand %p171_p1, %p168_p0 }
   0x8   :  { %176 = shalt.err (!%p173_p2)
}
   0x9   :  { %s177_s21 = scalar_lea.vmem %s17_s13, 128  ;;  %p182_p4 = scmp.lt.s32.totalorder %s17_s13, %s17_s13 }
   0xa   :  { %p178_p3 = scmp.ne.s32.totalorder %s17_s13, %s177_s21  ;;  %p183_p5 = scmp.lt.s32.totalorder %s177_s21, %s177_s21 }
   0xc   :  { %p184_p6 = por %p183_p5, %p182_p4 }
   0xe   :  { %p185_p7 = pnand %p184_p6, %p178_p3 }
  0x10   :  { %188 = shalt.err (!%p185_p7)
}
  0x11   :  { %s240_s22 = smov 64   ;;  %s241_s23 = smov 4  }
  0x12   :  { %22 = dma.hbm_to_vmem [thread:$0]  %s307_s0, 128, %s17_s13, [#allocation3], %s240_s22, %s240_s22, %s241_s23  }
  0x13   :  { %s242_s26 = smov [#allocation5]   ;;  %s189_s30 = scalar_lea.hbm %s308_s1, 256 }
  0x14   :  { %s28_s27 = sshll.u32 %s242_s26, 4  ;;  %p190_p8 = scmp.ne.s32.totalorder %s308_s1, %s189_s30  ;;  %s29_s27 = int_to_ptr.vmem [resolvable:$true] %s28_s27 }
  0x15   :  { %p193_p9 = scmp.lt.u32.totalorder %s189_s30, %s308_s1 }
  0x17   :  { %p195_p10 = pnand %p193_p9, %p190_p8 }
  0x19   :  { %198 = shalt.err (!%p195_p10)
}
  0x1a   :  { %s199_s8 = scalar_lea.vmem %s29_s27, 256  ;;  %p204_p12 = scmp.lt.s32.totalorder %s29_s27, %s29_s27 }
  0x1b   :  { %p200_p11 = scmp.ne.s32.totalorder %s29_s27, %s199_s8  ;;  %p205_p13 = scmp.lt.s32.totalorder %s199_s8, %s199_s8 }
  0x1d   :  { %p206_p0 = por %p205_p13, %p204_p12 }
  0x1f   :  { %p207_p1 = pnand %p206_p0, %p200_p11 }
  0x21   :  { %210 = shalt.err (!%p207_p1)
}
  0x22   :  { %34 = dma.hbm_to_vmem [thread:$0]  %s308_s1, 256, %s29_s27, [#allocation6], %s240_s22, %s240_s22, %s241_s23  }
  0x23   :  { %233 = dma.done.wait [#allocation3], 128  }
  0x24   :  { %234 = vsyncadd [#allocation3], 4294967168 }
  0x25   :  { %235 = dma.done.wait [#allocation6], 256  }
  0x26   :  { %236 = vsyncadd [#allocation6], 4294967040  ;;  %v243_v0 = vmov 0.0   ;;  %vm244_vm0 = vmmov 0   ;;  %v164_v1 = vld [vmem:[#allocation5] sm:$0xff]   ;;  %v165_v2 = vld [vmem:[#allocation5 + $0x8] sm:$0xff]  }
  0x27   :  { %147 = vmatprep.subr.bf16.mxu0 %v243_v0  ;;  %151 = vmatprep.mubr.msk.bf16.mxu0 %vm244_vm0, %v243_v0  ;;  %v166_v3 = vld [vmem:[#allocation2] sm:$0xff]   ;;  %vm74_vm1 = vcmask 261120   ;;  %s245_s1 = smov [#allocation7]  }
  0x28   :  { %148 = vmatpush3.bf16.msra.mxu0 %v164_v1  ;;  %v139_v4 = vld [vmem:[%s309_s2] ss:$0 sm:$0xff]  ;;  %s126_s12 = sshll.u32 %s245_s1, 4  ;;  %s127_s12 = int_to_ptr.vmem [resolvable:$true] %s126_s12 }
  0x29   :  { %149 = vmatprep.subr.bf16.mxu0 %v243_v0  ;;  %s211_s13 = scalar_lea.vmem %s127_s12, 256  ;;  %p216_p3 = scmp.lt.s32.totalorder %s127_s12, %s127_s12 }
  0x2a   :  { %p212_p2 = scmp.ne.s32.totalorder %s127_s12, %s211_s13  ;;  %p217_p4 = scmp.lt.s32.totalorder %s211_s13, %s211_s13 }
  0x2c   :  { %150 = vmatpush3.bf16.msra.mxu0 %v165_v2  ;;  %p218_p5 = por %p217_p4, %p216_p3 }
  0x2e   :  { %p219_p6 = pnand %p218_p5, %p212_p2 }
  0x2f   :  { %152 = vmatmul.mubr.msk.bf16.vlgmr.msra.gmra.mrb[0].mxu0 %vm74_vm1, %v166_v3 }
 0x102   :  { %v112_v5 = vpop.f32.mrb[0].mxu0 }
 0x103   :  { %v113_v6 = vadd.f32 %v139_v4, %v112_v5  ;;  %v153_v7 = vpop.f32.mrb[1].mxu0 }
 0x104   :  { %v115_v8 = vpop.f32.mrb[2].mxu0 }
 0x105   :  { %119 = vst [vmem:[#allocation7] sm:$0xff] %v113_v6  ;;  %v116_v9 = vadd.f32 %v139_v4, %v115_v8  ;;  %v154_v10 = vpop.f32.mrb[3].mxu0 }
 0x107   :  { %120 = vst [vmem:[#allocation7 + $0x8] sm:$0xff] %v116_v9 }
 0x108   :  { %222 = shalt.err (!%p219_p6)
}
 0x109   :  { %s223_s15 = scalar_lea.hbm %s310_s3, 256 }
 0x10a   :  { %p224_p7 = scmp.ne.s32.totalorder %s310_s3, %s223_s15  ;;  %p227_p8 = scmp.lt.u32.totalorder %s223_s15, %s310_s3 }
 0x10c   :  { %p229_p9 = pnand %p227_p8, %p224_p7 }
 0x10e   :  { %232 = shalt.err (!%p229_p9)
}
 0x10f   :  { %s246_s20 = smov 128   ;;  %s247_s21 = smov 8  }
 0x110   :  { %132 = dma.vmem_to_hbm [thread:$0]  %s127_s12, 256, %s310_s3, [#allocation4], %s246_s20, %s246_s20, %s247_s21  }
 0x111   :  { %237 = dma.done.wait [#allocation4], 256  }
 0x112   :  { %238 = vsyncadd [#allocation4], 4294967040 }
 0x113   :  { %136 = vsyncpa [#allocation3], 1 }
 0x114   :  { %137 = vsyncpa [#allocation6], 1 }
 0x115   :  { %138 = vsyncpa [#allocation4], 1 }

</bundles_post_ra>
